<compile_context>
chip_gen: v6e
topology: v6e:2x2x1
jax: 0.10.0
libtpu: 0.0.40
codegen_flags: <defaults>
</compile_context>

<pallas_src>
import math

import jax
import jax.numpy as jnp
from jax.experimental import pallas as pl
from jax.experimental.pallas import tpu as pltpu


def _gelu_tanh(x):
    # tanh-approximate GELU (f32 elementwise; tanh lowers to the EUP slot).
    # TODO(synk): torch's nn.GELU() default is the exact erf form; swap in erf
    # if bit-exactness with PyTorch is required (~1e-3 deviation).
    c = 0.7978845608028654  # sqrt(2/pi)
    return 0.5 * x * (1.0 + jnp.tanh(c * (x + 0.044715 * x * x * x)))


def _round_up(x, m):
    return (x + m - 1) // m * m


# ---------------------------------------------------------------------------
# Kernel A: weight-resident path.  1-D grid over token tiles; w1/w2/b1/b2 have
# constant index maps so they stay in VMEM across all token tiles (one HBM
# read total).  Matmuls run in the native (low-precision) dtype on the MXU
# with f32 accumulation; only the elementwise epilogue is f32.
# ---------------------------------------------------------------------------
def _residual_ff_resident_kernel(x_ref, w1_ref, b1_ref, w2_ref, b2_ref, o_ref):
    x = x_ref[...]                                                  # (tm, dp)
    h = jnp.dot(x, w1_ref[...], preferred_element_type=jnp.float32)
    h = _gelu_tanh(h + b1_ref[...].astype(jnp.float32))            # (tm, hp) f32
    y = jnp.dot(h.astype(w2_ref.dtype), w2_ref[...],
                preferred_element_type=jnp.float32)
    y = y + b2_ref[...].astype(jnp.float32) + x.astype(jnp.float32)  # + residual
    o_ref[...] = y.astype(o_ref.dtype)


# ---------------------------------------------------------------------------
# Kernel B: streamed-weight path (weights too large for VMEM residence).
# Grid = (token tiles [parallel], hidden tiles [arbitrary]); f32 accumulator.
# ---------------------------------------------------------------------------
def _residual_ff_stream_kernel(x_ref, w1_ref, b1_ref, w2_ref, b2_ref, o_ref,
                               acc_ref):
    k = pl.program_id(1)

    @pl.when(k == 0)
    def _init():
        acc_ref[...] = jnp.zeros_like(acc_ref)

    x = x_ref[...]                                                  # (tm, dp)
    h = jnp.dot(x, w1_ref[...], preferred_element_type=jnp.float32)
    h = _gelu_tanh(h + b1_ref[...].astype(jnp.float32))            # (tm, th) f32
    acc_ref[...] += jnp.dot(h.astype(w2_ref.dtype), w2_ref[...],
                            preferred_element_type=jnp.float32)

    @pl.when(k == pl.num_programs(1) - 1)
    def _finalize():
        y = acc_ref[...] + b2_ref[...].astype(jnp.float32) + x.astype(jnp.float32)
        o_ref[...] = y.astype(o_ref.dtype)


def _pick_tile_m(tokens, tm):
    """Prefer a token tile that divides `tokens` (avoids row-padding copies)."""
    tm = max(8, (tm // 8) * 8)
    if tokens % tm == 0:
        return tm, tokens
    best = None
    start = max(8, (min(tm, tokens) // 8) * 8)
    for t in range(start, 7, -8):
        if tokens % t == 0:
            best = t
            break
    if best is not None and best * 4 >= min(tm, tokens):
        return best, tokens
    tm = min(tm, _round_up(tokens, 8))
    return tm, _round_up(tokens, tm)


def residual_feedforward(x, w1, b1, w2, b2, *, tile_m=None, tile_h=None):
    """out = fn(x) + x, fn = Linear -> GELU -> Linear.

    x: (tokens, dim); w1: (dim, hidden); b1: (hidden,); w2: (hidden, dim); b2: (dim,).
    """
    tokens, dim = x.shape
    hidden = w1.shape[1]
    isz = jnp.dtype(x.dtype).itemsize
    b1 = b1.reshape(1, hidden)
    b2 = b2.reshape(1, dim)

    # ---- generation-aware VMEM budget --------------------------------------
    try:
        vmem_cap = int(pltpu.get_tpu_info().vmem_capacity_bytes)
    except Exception:
        vmem_cap = 64 * 2**20                          # conservative default
    try:
        is_v5 = "v5" in jax.devices()[0].device_kind.lower()
    except Exception:
        is_v5 = False
    if vmem_cap >= 100 * 2**20:                        # v5e / v6e: 128 MiB physical
        budget = 100 * 2**20
        stream_tile_m = 768                            # keep streamed weights MXU-bound
    else:                                              # v7x-class: 64 MiB physical
        budget = max(32 * 2**20, vmem_cap - 12 * 2**20)
        stream_tile_m = 256

    # ---- lane-dense padding targets (last dims -> multiples of 128) --------
    dp = _round_up(dim, 128)
    hp = _round_up(hidden, 128)

    # ---- resident vs streamed weight decision -------------------------------
    w_resident_bytes = 2 * (dp * hp + hp * dp) * isz + 2 * 8 * (hp + dp) * isz

    def resident_bytes(tm_):
        return (w_resident_bytes
                + 4 * tm_ * dp * isz                   # x + out tiles (double-buffered)
                + tm_ * hp * 4 + tm_ * dp * 4)         # f32 h + f32 epilogue temps

    tm = tile_m if tile_m is not None else 256
    tm = min(tm, _round_up(tokens, 8))
    while tm > 64 and resident_bytes(tm) > budget:
        tm //= 2
    resident = resident_bytes(tm) <= budget

    th = hp
    if not resident:
        tm = tile_m if tile_m is not None else stream_tile_m
        tm = min(tm, _round_up(tokens, 8))
        th = tile_h if tile_h is not None else min(512, hp)   # 256-multiple for v6e/v7x MXU
        if hp % th:
            th = math.gcd(hp, th)                      # both 128-multiples -> >= 128

        def stream_bytes(tm_, th_):
            return (4 * tm_ * dp * isz                 # x + out tiles (double-buffered)
                    + 2 * dp * th_ * isz + 2 * th_ * dp * isz   # streamed w1 / w2 tiles
                    + 2 * 8 * (th_ + dp) * isz         # biases (sublane padded)
                    + tm_ * dp * 4                     # f32 accumulator scratch
                    + tm_ * th_ * 4)                   # f32 intermediate h

        while tm > 64 and stream_bytes(tm, th) > budget:
            tm //= 2
        # TODO(synk): for very large dp (>= 4096) tile the output dim with a
        # third grid axis instead of only shrinking tile_m.

    tile_m, tokens_p = _pick_tile_m(tokens, tm)

    # ---- pad only what actually needs padding -------------------------------
    if tokens_p != tokens or dp != dim:
        xp = jnp.pad(x, ((0, tokens_p - tokens), (0, dp - dim)))
    else:
        xp = x                                         # no wrapper-side copy of x
    w1p = jnp.pad(w1, ((0, dp - dim), (0, hp - hidden))) if (dp != dim or hp != hidden) else w1
    b1p = jnp.pad(b1, ((0, 0), (0, hp - hidden))) if hp != hidden else b1
    w2p = jnp.pad(w2, ((0, hp - hidden), (0, dp - dim))) if (dp != dim or hp != hidden) else w2
    b2p = jnp.pad(b2, ((0, 0), (0, dp - dim))) if dp != dim else b2

    n_token_tiles = tokens_p // tile_m
    weight_passes = 1 if resident else n_token_tiles
    cost = pl.CostEstimate(
        flops=4 * tokens_p * dp * hp,                  # two matmuls
        transcendentals=tokens_p * hp,                 # one tanh per hidden element
        bytes_accessed=(2 * tokens_p * dp * isz        # x read + out write
                        + weight_passes * 2 * dp * hp * isz   # weights (re-)streamed
                        + (hp + dp) * isz))            # biases

    if resident:
        est = resident_bytes(tile_m)
        vmem_limit = int(min(budget, max(32 * 2**20, 2 * est)))
        out_p = pl.pallas_call(
            _residual_ff_resident_kernel,
            out_shape=jax.ShapeDtypeStruct((tokens_p, dp), x.dtype),
            grid_spec=pltpu.PrefetchScalarGridSpec(
                num_scalar_prefetch=0,
                grid=(n_token_tiles,),
                in_specs=[
                    pl.BlockSpec((tile_m, dp), lambda i: (i, 0)),  # x tile
                    pl.BlockSpec((dp, hp), lambda i: (0, 0)),      # w1 (VMEM resident)
                    pl.BlockSpec((1, hp), lambda i: (0, 0)),       # b1
                    pl.BlockSpec((hp, dp), lambda i: (0, 0)),      # w2 (VMEM resident)
                    pl.BlockSpec((1, dp), lambda i: (0, 0)),       # b2
                ],
                out_specs=pl.BlockSpec((tile_m, dp), lambda i: (i, 0)),
            ),
            compiler_params=pltpu.CompilerParams(
                dimension_semantics=("parallel",),
                vmem_limit_bytes=vmem_limit),
            cost_estimate=cost,
        )(xp, w1p, b1p, w2p, b2p)
    else:
        est = stream_bytes(tile_m, th)
        vmem_limit = int(min(budget, max(32 * 2**20, 2 * est)))
        # v5e has the lowest HBM BW relative to its MXU: buffer the two large
        # streamed weight operands three-deep to hide DMA latency spikes.
        w_kwargs = dict(pipeline_mode=pl.Buffered(3)) if is_v5 else {}
        out_p = pl.pallas_call(
            _residual_ff_stream_kernel,
            out_shape=jax.ShapeDtypeStruct((tokens_p, dp), x.dtype),
            grid_spec=pltpu.PrefetchScalarGridSpec(
                num_scalar_prefetch=0,
                grid=(n_token_tiles, hp // th),        # reduction (hidden) axis last
                in_specs=[
                    pl.BlockSpec((tile_m, dp), lambda i, k: (i, 0)),          # x
                    pl.BlockSpec((dp, th), lambda i, k: (0, k), **w_kwargs),  # w1 col tile
                    pl.BlockSpec((1, th), lambda i, k: (0, k)),               # b1 tile
                    pl.BlockSpec((th, dp), lambda i, k: (k, 0), **w_kwargs),  # w2 row tile
                    pl.BlockSpec((1, dp), lambda i, k: (0, 0)),               # b2
                ],
                out_specs=pl.BlockSpec((tile_m, dp), lambda i, k: (i, 0)),
                scratch_shapes=[pltpu.VMEM((tile_m, dp), jnp.float32)],
            ),
            compiler_params=pltpu.CompilerParams(
                dimension_semantics=("parallel", "arbitrary"),
                vmem_limit_bytes=vmem_limit),
            cost_estimate=cost,
        )(xp, w1p, b1p, w2p, b2p)

    if tokens_p != tokens or dp != dim:
        out_p = out_p[:tokens, :dim]
    return out_p


def _reference(x, w1, b1, w2, b2):
    # Same mixed-precision flow as the kernel (native-dtype matmuls, f32 acc).
    h = (jnp.dot(x, w1, preferred_element_type=jnp.float32)
         + b1.reshape(1, -1).astype(jnp.float32))
    h = _gelu_tanh(h)
    y = jnp.dot(h.astype(w2.dtype), w2, preferred_element_type=jnp.float32)
    y = y + b2.reshape(1, -1).astype(jnp.float32) + x.astype(jnp.float32)
    return y.astype(x.dtype)


if __name__ == "__main__":
    # Small miniformer-ish shapes: dim=32, hidden=64, tokens = batch*seq = 256.
    batch, seq, dim, hidden = 2, 128, 32, 64
    dtype = jnp.bfloat16   # native low-precision matmul operands (MXU fast path)

    key = jax.random.PRNGKey(0)
    kx, kw1, kb1, kw2, kb2 = jax.random.split(key, 5)

    x_bsd = jax.random.normal(kx, (batch, seq, dim), jnp.float32).astype(dtype)
    w1 = (jax.random.normal(kw1, (dim, hidden), jnp.float32) / math.sqrt(dim)).astype(dtype)
    b1 = (jax.random.normal(kb1, (hidden,), jnp.float32) * 0.01).astype(dtype)
    w2 = (jax.random.normal(kw2, (hidden, dim), jnp.float32) / math.sqrt(hidden)).astype(dtype)
    b2 = (jax.random.normal(kb2, (dim,), jnp.float32) * 0.01).astype(dtype)

    # Glue: flatten (batch, seq, dim) -> (tokens, dim); pure reshape.
    x = x_bsd.reshape(batch * seq, dim)

    # Tiny demo weights -> weight-resident path; tile_m=128 gives a multi-step
    # "parallel" grid (pipelining + megacore sharding) even at these shapes.
    out = residual_feedforward(x, w1, b1, w2, b2, tile_m=128)
    out = jax.block_until_ready(out)

    ref = _reference(x, w1, b1, w2, b2)
    assert out.shape == (batch * seq, dim)
    assert jnp.allclose(out.astype(jnp.float32), ref.astype(jnp.float32),
                        atol=5e-2, rtol=5e-2), "mismatch vs reference"

    # Restore original layout (batch, seq, dim) — pure reshape.
    out = out.reshape(batch, seq, dim)
    jax.block_until_ready(out)
    print("KERNEL_OK")
</pallas_src>

<mosaic_0001>
module attributes {stable_mosaic.version = 11 : i64} {
  func.func @_residual_ff_resident_kernel(%arg0: i32, %arg1: memref<128x128xbf16, #tpu.memory_space<vmem>>, %arg2: memref<128x128xbf16, #tpu.memory_space<vmem>>, %arg3: memref<1x128xbf16, #tpu.memory_space<vmem>>, %arg4: memref<128x128xbf16, #tpu.memory_space<vmem>>, %arg5: memref<1x128xbf16, #tpu.memory_space<vmem>>, %arg6: memref<128x128xbf16, #tpu.memory_space<vmem>>) attributes {dimension_semantics = [#tpu.dimension_semantics<parallel>], iteration_bounds = array<i64: 2>, scalar_prefetch = 0 : i64, scratch_operands = 0 : i64, tpu.core_type = #tpu.core_type<tc>, window_params = [{transform_indices = @transform_0, window_bounds = array<i64: 128, 128>}, {pipeline_mode = #tpu.pipeline_mode<synchronous>, transform_indices = @transform_1, window_bounds = array<i64: 128, 128>}, {pipeline_mode = #tpu.pipeline_mode<synchronous>, transform_indices = @transform_2, window_bounds = array<i64: 1, 128>}, {pipeline_mode = #tpu.pipeline_mode<synchronous>, transform_indices = @transform_3, window_bounds = array<i64: 128, 128>}, {pipeline_mode = #tpu.pipeline_mode<synchronous>, transform_indices = @transform_4, window_bounds = array<i64: 1, 128>}, {transform_indices = @transform_5, window_bounds = array<i64: 128, 128>}]} {
    %c0 = arith.constant 0 : index
    %c0_0 = arith.constant 0 : index
    %0 = vector.load %arg1[%c0, %c0_0] : memref<128x128xbf16, #tpu.memory_space<vmem>>, vector<128x128xbf16>
    %c0_1 = arith.constant 0 : index
    %c0_2 = arith.constant 0 : index
    %1 = vector.load %arg2[%c0_1, %c0_2] : memref<128x128xbf16, #tpu.memory_space<vmem>>, vector<128x128xbf16>
    %cst = arith.constant dense<0.000000e+00> : vector<128x128xf32>
    %2 = tpu.matmul %0, %1, %cst {dimension_numbers = #tpu.dot_dimension_numbers<[1], [0], [0], [1], [0, 0, 1, 1], [], []>} : vector<128x128xbf16>, vector<128x128xbf16>, vector<128x128xf32> -> vector<128x128xf32>
    %c0_3 = arith.constant 0 : index
    %c0_4 = arith.constant 0 : index
    %3 = vector.load %arg3[%c0_3, %c0_4] : memref<1x128xbf16, #tpu.memory_space<vmem>>, vector<1x128xbf16>
    %4 = arith.extf %3 : vector<1x128xbf16> to vector<1x128xf32>
    %5 = vector.broadcast %4 : vector<1x128xf32> to vector<128x128xf32>
    %6 = arith.addf %2, %5 : vector<128x128xf32>
    %cst_5 = arith.constant 5.000000e-01 : f32
    %7 = vector.broadcast %cst_5 : f32 to vector<128x128xf32>
    %8 = arith.mulf %7, %6 : vector<128x128xf32>
    %cst_6 = arith.constant 4.471500e-02 : f32
    %9 = vector.broadcast %cst_6 : f32 to vector<128x128xf32>
    %10 = arith.mulf %9, %6 : vector<128x128xf32>
    %11 = arith.mulf %10, %6 : vector<128x128xf32>
    %12 = arith.mulf %11, %6 : vector<128x128xf32>
    %13 = arith.addf %6, %12 : vector<128x128xf32>
    %cst_7 = arith.constant 0.797884583 : f32
    %14 = vector.broadcast %cst_7 : f32 to vector<128x128xf32>
    %15 = arith.mulf %14, %13 : vector<128x128xf32>
    %16 = math.tanh %15 : vector<128x128xf32>
    %cst_8 = arith.constant 1.000000e+00 : f32
    %17 = vector.broadcast %cst_8 : f32 to vector<128x128xf32>
    %18 = arith.addf %17, %16 : vector<128x128xf32>
    %19 = arith.mulf %8, %18 : vector<128x128xf32>
    %20 = arith.truncf %19 : vector<128x128xf32> to vector<128x128xbf16>
    %c0_9 = arith.constant 0 : index
    %c0_10 = arith.constant 0 : index
    %21 = vector.load %arg4[%c0_9, %c0_10] : memref<128x128xbf16, #tpu.memory_space<vmem>>, vector<128x128xbf16>
    %cst_11 = arith.constant dense<0.000000e+00> : vector<128x128xf32>
    %22 = tpu.matmul %20, %21, %cst_11 {dimension_numbers = #tpu.dot_dimension_numbers<[1], [0], [0], [1], [0, 0, 1, 1], [], []>} : vector<128x128xbf16>, vector<128x128xbf16>, vector<128x128xf32> -> vector<128x128xf32>
    %c0_12 = arith.constant 0 : index
    %c0_13 = arith.constant 0 : index
    %23 = vector.load %arg5[%c0_12, %c0_13] : memref<1x128xbf16, #tpu.memory_space<vmem>>, vector<1x128xbf16>
    %24 = arith.extf %23 : vector<1x128xbf16> to vector<1x128xf32>
    %25 = vector.broadcast %24 : vector<1x128xf32> to vector<128x128xf32>
    %26 = arith.addf %22, %25 : vector<128x128xf32>
    %27 = arith.extf %0 : vector<128x128xbf16> to vector<128x128xf32>
    %28 = arith.addf %26, %27 : vector<128x128xf32>
    %29 = arith.truncf %28 : vector<128x128xf32> to vector<128x128xbf16>
    %c0_14 = arith.constant 0 : index
    %c0_15 = arith.constant 0 : index
    %30 = vector.load %arg6[%c0_14, %c0_15] : memref<128x128xbf16, #tpu.memory_space<vmem>>, vector<128x128xbf16>
    tpu.vector_store %arg6[%c0_14, %c0_15], %29 {strides = array<i32>} : memref<128x128xbf16, #tpu.memory_space<vmem>>, vector<128x128xbf16>,
    return
  }
  func.func @transform_0(%arg0: i32) -> (i32, i32) {
    %c0_i32 = arith.constant 0 : i32
    %c0_i32_0 = arith.constant 0 : i32
    return %arg0, %c0_i32 : i32, i32
  }
  func.func @transform_1(%arg0: i32) -> (i32, i32) {
    %c0_i32 = arith.constant 0 : i32
    %c0_i32_0 = arith.constant 0 : i32
    %c0_i32_1 = arith.constant 0 : i32
    return %c0_i32, %c0_i32_0 : i32, i32
  }
  func.func @transform_2(%arg0: i32) -> (i32, i32) {
    %c0_i32 = arith.constant 0 : i32
    %c0_i32_0 = arith.constant 0 : i32
    %c0_i32_1 = arith.constant 0 : i32
    return %c0_i32, %c0_i32_0 : i32, i32
  }
  func.func @transform_3(%arg0: i32) -> (i32, i32) {
    %c0_i32 = arith.constant 0 : i32
    %c0_i32_0 = arith.constant 0 : i32
    %c0_i32_1 = arith.constant 0 : i32
    return %c0_i32, %c0_i32_0 : i32, i32
  }
  func.func @transform_4(%arg0: i32) -> (i32, i32) {
    %c0_i32 = arith.constant 0 : i32
    %c0_i32_0 = arith.constant 0 : i32
    %c0_i32_1 = arith.constant 0 : i32
    return %c0_i32, %c0_i32_0 : i32, i32
  }
  func.func @transform_5(%arg0: i32) -> (i32, i32) {
    %c0_i32 = arith.constant 0 : i32
    %c0_i32_0 = arith.constant 0 : i32
    return %arg0, %c0_i32 : i32, i32
  }
}

</mosaic_0001>

<bundles_post_ra>
// kernel: tpu_custom_call.1
= control target key start
LH: loop header
LB: loop body
LE: loop exit
PB: predicated region body
PF: predicated region fallthrough
CT: control target
= control target key end

     0   :  { %10 = vsyncpa [#allocation3], 0  ;;  %s2008_s0 = inlined_call_operand.hbm [shape: bf16[256,128], index: 0, kind: input, shape index: {}]   ;;  %s2009_s1 = inlined_call_operand.hbm [shape: bf16[128,128], index: 1, kind: input, shape index: {}]   ;;  %s2010_s2 = inlined_call_operand.vmem [shape: bf16[1,128], index: 2, kind: input, shape index: {}]   ;;  %s2011_s3 = inlined_call_operand.hbm [shape: bf16[128,128], index: 3, kind: input, shape index: {}]   ;;  %s2012_s4 = inlined_call_operand.vmem [shape: bf16[1,128], index: 4, kind: input, shape index: {}]   ;;  %s2013_s5 = inlined_call_operand.hbm [shape: bf16[256,128], index: 5, kind: output, shape index: {}]  }
   0x1   :  { %12 = vsyncpa [#allocation3 + $0x1], 0 }
   0x2   :  { %13 = vsyncpa [#allocation6], 0 }
   0x3   :  { %14 = vsyncpa [#allocation4], 0 }
   0x4   :  { %16 = vsyncpa [#allocation4 + $0x1], 0  ;;  %s1585_s18 = smov 0   ;;  %s1587_s19 = smov 0  }
   0x5   :  { %s1589_s20 = smov 0   ;;  %s1591_s21 = smov 0  }
   0x6 LB: > { %s1606_s22 = sadd.s32 4294967295, %s1545_s21   ;;  %s1043_s23 = sadd.s32 4294967294, %s1545_s21   ;;  %s1545_s21 = sphi %s1591_s21, %s2036_s21   ;;  %s1541_s20 = sphi %s1589_s20, %s2035_s20   ;;  %s1537_s19 = sphi %s1587_s19, %s2034_s19   ;;  %s1533_s18 = sphi %s1585_s18, %s2033_s18  }
   0x7   : > { %p42_p0 = scmp.ne.s32.totalorder %s1537_s19, %s1533_s18  ;;  %p2014_p1 = scmp.eq.s32.totalorder %s1606_s22, 0 }
   0x8   : > { %p150_p2 = scmp.eq.s32.totalorder %s1606_s22, 1  ;;  %p156_p3 = scmp.eq.s32.totalorder %s1043_s23, 1 }
   0x9   : > { %p1615_p4 = por %p2014_p1, %p42_p0  ;;  %p1044_p5 = scmp.ge.s32.totalorder %s1545_s21, 1 }
   0xa   : > { %p1620_p6 = por %p156_p3, %p42_p0  ;;  %p163_p7 = scmp.lt.s32.totalorder %s1545_s21, 3 }
   0xb   : > { %s2019_s24 = scalar_select %p1615_p4, 1, 0 }
   0xc   : > { %s2020_s25 = scalar_select %p1620_p6, 1, 0 }
   0xd   : > { %p1625_p8 = pnand %p1044_p5, %p163_p7  ;;  %s1547_s27 = smov [#allocation5]  }
   0xe   : > { %s175_s28 = sshll.u32 %s1547_s27, 4  ;;  %s1548_s30 = smov [#allocation7]   ;;  %s176_s28 = int_to_ptr.vmem [resolvable:$true] %s175_s28 }
   0xf   : > { %s2021_s26 = scalar_select %p1625_p8, 1, 0 }
  0x10   : > { %p1274_p9 = pneg %p1625_p8  ;;  %s191_s6 = sshll.u32 %s1548_s30, 4  ;;  %s192_s6 = int_to_ptr.vmem [resolvable:$true] %s191_s6 }
  0x11   : > { %s1408_s7 = scalar_lea.vmem %s176_s28, 1024  ;;  %p1416_p5 = scmp.lt.s32.totalorder %s176_s28, %s176_s28 }
  0x12   : > { %p1634_p11 = pnand %p1274_p9, %p2014_p1  ;;  %p1409_p13 = scmp.ne.s32.totalorder %s176_s28, %s1408_s7 }
  0x13   : > { %p1417_p7 = scmp.lt.s32.totalorder %s1408_s7, %s1408_s7 }
  0x14   : > { %p1399_p12 = pneg %p1634_p11 }
  0x15   : > { %p1418_p10 = por %p1417_p7, %p1416_p5 }
  0x16   : > { %p1411_p0 = pnand %p1409_p13, %p1399_p12 }
  0x18   : > { %p1412_p3 = pneg %p1411_p0 }
  0x1a   : > { %p1419_p9 = pnand %p1418_p10, %p1412_p3 }
  0x1c   : > { %1422 = shalt.err (!%p1419_p9)
}
  0x1d   : > { %s2015_s8 = smov 64   ;;  %s1550_s9 = smov 4  }
  0x1e   : > { %1277 = dma.hbm_to_vmem [thread:$0]  (!%p1634_p11), %s2009_s1, 1024, %s176_s28, [#allocation6], %s2015_s8, %s2015_s8, %s1550_s9  }
  0x1f   : > { %s1434_s12 = scalar_lea.vmem %s192_s6, 1024  ;;  %p1442_p10 = scmp.lt.s32.totalorder %s192_s6, %s192_s6 }
  0x20   : > { %p1435_p13 = scmp.ne.s32.totalorder %s192_s6, %s1434_s12  ;;  %p1443_p3 = scmp.lt.s32.totalorder %s1434_s12, %s1434_s12 }
  0x22   : > { %p1437_p0 = pnand %p1435_p13, %p1399_p12  ;;  %p1444_p7 = por %p1443_p3, %p1442_p10 }
  0x24   : > { %p1438_p5 = pneg %p1437_p0 }
  0x26   : > { %p1445_p9 = pnand %p1444_p7, %p1438_p5 }
  0x28   : > { %1448 = shalt.err (!%p1445_p9)
}
  0x29   : > { %1280 = dma.hbm_to_vmem [thread:$0]  (!%p1634_p11), %s2011_s3, 1024, %s192_s6, [#allocation6], %s2015_s8, %s2015_s8, %s1550_s9  }
  0x2a   : > { %s1663_s15 = sadd.s32 1, %s1545_s21   ;;  %s29_s16 = sadd.s32 1, %s1541_s20 }
  0x2b   : > { %s26_s17 = ssub.s32 %s1545_s21, %s1663_s15  ;;  %p36_p12 = scmp.ne.s32.totalorder %s1541_s20, %s1537_s19 }
  0x2c   : > { %p27_p13 = scmp.eq.s32.totalorder %s26_s17, 0  ;;  %p37_p0 = scmp.eq.s32.totalorder %s1545_s21, 0 }
  0x2d   : > { %p1673_p5 = por %p150_p2, %p36_p12  ;;  %p1291_p10 = scmp.lt.s32.totalorder %s1545_s21, 2 }
  0x2e   : > { %s1679_s27 = scalar_select %p27_p13, %s1541_s20, %s29_s16  }
  0x2f   : > { %s2023_s23 = scalar_select %p1673_p5, 1, 0 }
  0x30   : > { %p38_p3 = por %p37_p0, %p36_p12  ;;  %s208_s28 = sand.u32 1, %s1541_s20  }
  0x31   : > { %s1048_s29 = sshll.u32 %s208_s28, 6  ;;  %s1101_s30 = sshll.u32 %s1545_s21, 10 }
  0x32   : > { %s1686_s10 = scalar_lea.hbm %s2008_s0, %s1101_s30  ;;  %s212_s11 = scalar_lea.vmem [#allocation2], %s1048_s29 }
  0x33   : > { %s219_s12 = sshll.u32 %s212_s11, 4  ;;  %p1690_p2 = pnand %p1291_p10, %p38_p3  ;;  %s1688_s12 = int_to_ptr.vmem [resolvable:$true] %s219_s12 }
  0x34   : > { %s1694_s14 = scalar_lea.sflag [#allocation3], %s208_s28  ;;  %s1449_s16 = scalar_lea.hbm %s1686_s10, 1024 }
  0x35   : > { %p1450_p11 = scmp.ne.s32.totalorder %s1686_s10, %s1449_s16  ;;  %p1451_p7 = pneg %p1690_p2 }
  0x36   : > { %s1454_s29 = scalar_lea.hbm %s2008_s0, 2048  ;;  %p1455_p13 = scmp.lt.s32.totalorder %s1686_s10, %s2008_s0 }
  0x37   : > { %p1452_p9 = pnand %p1451_p7, %p1450_p11  ;;  %p1456_p0 = scmp.lt.s32.totalorder %s1454_s29, %s1449_s16 }
  0x39   : > { %p1453_p12 = pneg %p1452_p9  ;;  %p1457_p10 = por %p1456_p0, %p1455_p13 }
  0x3b   : > { %p1458_p3 = pnand %p1457_p10, %p1453_p12 }
  0x3d   : > { %1461 = shalt.err (!%p1458_p3)
}
  0x3e   : > { %s1462_s28 = scalar_lea.vmem %s1688_s12, 1024  ;;  %s1551_s11 = smov [#allocation2]  }
  0x3f   : > { %p1463_p1 = scmp.ne.s32.totalorder %s1688_s12, %s1462_s28  ;;  %s1467_s8 = sshll.u32 %s1551_s11, 4  ;;  %s1468_s8 = int_to_ptr.vmem [resolvable:$false] %s1467_s8 }
  0x40   : > { %s1469_s17 = scalar_lea.vmem %s1468_s8, 2048  ;;  %p1470_p9 = scmp.lt.s32.totalorder %s1688_s12, %s1468_s8 }
  0x41   : > { %p1465_p6 = pnand %p1463_p1, %p1451_p7  ;;  %p1471_p5 = scmp.lt.s32.totalorder %s1469_s17, %s1462_s28 }
  0x43   : > { %p1466_p11 = pneg %p1465_p6  ;;  %p1472_p4 = por %p1471_p5, %p1470_p9 }
  0x45   : > { %p1473_p8 = pnand %p1472_p4, %p1466_p11 }
  0x47   : > { %1476 = shalt.err (!%p1473_p8)
}
  0x48   : > { %s2025_s16 = smov 64   ;;  %p2026_p1 = scmp.ne.s32.totalorder %s2021_s26, 0 }
  0x49   : > { %1284 = dma.hbm_to_vmem [thread:$0]  (!%p1690_p2), %s1686_s10, 1024, %s1688_s12, %s1694_s14, %s2025_s16, %s2025_s16, %s1550_s9  }
  0x4a   : > { %231 = sbr.rel (%p2026_p1) target bundleno = 592 (0x250), region = 40  ;;  %s1721_s30 = sand.u32 (!%p2026_p1), 1, %s1537_s19  }
  0x4b   : > { %s1052_s8 = sshll.u32 (!%p2026_p1), %s1721_s30, 6  ;;  %s234_s29 = scalar_lea.sflag (!%p2026_p1), [#allocation3], %s1721_s30 }
  0x4c   : > { %s1727_s13 = scalar_lea.vmem (!%p2026_p1), [#allocation2], %s1052_s8  ;;  %p2027_p4 = scmp.ne.s32.totalorder (!%p2026_p1), %s2019_s24, 0 }
  0x4f   : > { %1520 = dma.done.wait (%p2027_p4), %s234_s29, 1024  }
  0x50   : > { %1522 = vsyncadd (%p2027_p4), %s234_s29, 4294966272  ;;  %p2028_p6 = scmp.eq.s32.totalorder %s1606_s22, 0 }
  0x52   : > { %1524 = dma.done.wait (%p2028_p6), [#allocation6], 2048   ;;  %p2029_p8 = pmov %p2028_p6 }
  0x53   : > { %v1333_v0 = vld [vmem:[#allocation5 + $0x38] sm:$0xff]   ;;  %v1334_v1 = vld [vmem:[#allocation5 + $0x30] sm:$0xff]   ;;  %v1335_v2 = vld [vmem:[#allocation5 + $0x28] sm:$0xff]   ;;  %v309_v24 = vlaneseq  ;;  %s1924_s12 = scalar_lea.vmem [#allocation8], %s1052_s8  ;;  %s1118_s14 = sshll.u32 %s1606_s22, 10 }
  0x54   : > { %1526 = vsyncadd (%p2029_p8), [#allocation6], 4294965248  ;;  %1198 = vmatprep.subr.bf16.mxu0 %v1333_v0  ;;  %v1336_v3 = vld [vmem:[#allocation5 + $0x20] sm:$0xff]   ;;  %v1337_v5 = vld [vmem:[#allocation5 + $0x18] sm:$0xff]   ;;  %s951_s6 = sshll.u32 %s1924_s12, 4  ;;  %s1961_s11 = scalar_lea.hbm %s2013_s5, %s1118_s14  ;;  %s1963_s6 = int_to_ptr.vmem [resolvable:$true] %s951_s6 }
  0x55   : > { %1199 = vmatpush3.bf16.msra.mxu0 %v1333_v0  ;;  %v1738_v4 = vld [vmem:[%s1727_s13] sm:$0xff]   ;;  %v1338_v6 = vld [vmem:[#allocation5 + $0x10] sm:$0xff]   ;;  %v1339_v7 = vld [vmem:[#allocation5 + $0x8] sm:$0xff]   ;;  %v1769_v25 = vshrl.u32 %v309_v24, 7  ;;  %s938_s17 = scalar_lea.sflag [#allocation4], %s1721_s30  ;;  %s1477_s16 = scalar_lea.vmem %s1963_s6, 1024 }
  0x56   : > { %1200 = vmatprep.subr.bf16.mxu0 %v1334_v1  ;;  %1214 = vmatprep.mubr.bf16.mxu0 %v1738_v4  ;;  %v1340_v8 = vld [vmem:[#allocation5] sm:$0xff]   ;;  %v1742_v9 = vld [vmem:[%s1727_s13 + $0x8] sm:$0xff]   ;;  %v1745_v10 = vld [vmem:[%s1727_s13 + $0x10] sm:$0xff]   ;;  %p1478_p5 = scmp.ne.s32.totalorder %s1963_s6, %s1477_s16  ;;  %p2030_p2 = scmp.ne.s32.totalorder %s2023_s23, 0 }
  0x57   : > { %v1750_v11 = vld [vmem:[%s1727_s13 + $0x18] sm:$0xff]   ;;  %v1753_v12 = vld [vmem:[%s1727_s13 + $0x20] sm:$0xff]   ;;  %v1758_v13 = vld [vmem:[%s1727_s13 + $0x28] sm:$0xff]   ;;  %v311_v28 = vsub.s32 0, %v1769_v25  ;;  %s1552_s22 = smov [#allocation8]  }
  0x58   : > { %v1761_v14 = vld [vmem:[%s1727_s13 + $0x30] sm:$0xff]   ;;  %v1766_v15 = vld [vmem:[%s1727_s13 + $0x38] sm:$0xff]   ;;  %v1351_v18 = vld [vmem:[#allocation7 + $0x28] sm:$0xff]   ;;  %p1479_p7 = pnand %p1478_p5, %p2030_p2  ;;  %s1481_s8 = sshll.u32 %s1552_s22, 4  ;;  %s1482_s8 = int_to_ptr.vmem [resolvable:$false] %s1481_s8 }
  0x59   : > { %1201 = vmatpush3.bf16.msra.mxu0 %v1334_v1  ;;  %v1349_v16 = vld [vmem:[#allocation7 + $0x38] sm:$0xff]   ;;  %v1350_v17 = vld [vmem:[#allocation7 + $0x30] sm:$0xff]   ;;  %v1352_v19 = vld [vmem:[#allocation7 + $0x20] sm:$0xff]   ;;  %s1483_s29 = scalar_lea.vmem %s1482_s8, 2048  ;;  %p1484_p13 = scmp.lt.s32.totalorder %s1963_s6, %s1482_s8 }
  0x5a   : > { %1202 = vmatprep.subr.bf16.mxu0 %v1335_v2  ;;  %1230 = vmatprep.subr.bf16.mxu1 %v1349_v16  ;;  %v1353_v20 = vld [vmem:[#allocation7 + $0x18] sm:$0xff]   ;;  %v1354_v21 = vld [vmem:[#allocation7 + $0x10] sm:$0xff]   ;;  %v1355_v22 = vld [vmem:[#allocation7 + $0x8] sm:$0xff]   ;;  %p1480_p12 = pneg %p1479_p7  ;;  %p1485_p0 = scmp.lt.s32.totalorder %s1483_s29, %s1477_s16 }
  0x5b   : > { %1231 = vmatpush3.bf16.msra.mxu1 %v1349_v16  ;;  %v1356_v23 = vld [vmem:[#allocation7] sm:$0xff]  }
  0x5c   : > { %1232 = vmatprep.subr.bf16.mxu1 %v1350_v17  ;;  %v307_v26 = vld [vmem:[%s2010_s2] sm:$0x1]  ;;  %p1486_p10 = por %p1485_p0, %p1484_p13 }
  0x5d   : > { %1203 = vmatpush3.bf16.msra.mxu0 %v1335_v2  ;;  %v308_v27 = vunpack.c.l.bf16 %v307_v26 }
  0x5e   : > { %1204 = vmatprep.subr.bf16.mxu0 %v1336_v3  ;;  %p1487_p3 = pnand %p1486_p10, %p1480_p12 }
  0x5f   : > { %1233 = vmatpush3.bf16.msra.mxu1 %v1350_v17  ;;  %v1777_v29 = vrot.slane %v308_v27, %v311_v28 }
  0x60   : > { %1234 = vmatprep.subr.bf16.mxu1 %v1351_v18 }
  0x61   : > { %1205 = vmatpush3.bf16.msra.mxu0 %v1336_v3 }
  0x62   : > { %1206 = vmatprep.subr.bf16.mxu0 %v1337_v5 }
  0x63   : > { %1235 = vmatpush3.bf16.msra.mxu1 %v1351_v18 }
  0x64   : > { %1236 = vmatprep.subr.bf16.mxu1 %v1352_v19 }
  0x65   : > { %1207 = vmatpush3.bf16.msra.mxu0 %v1337_v5 }
  0x66   : > { %1208 = vmatprep.subr.bf16.mxu0 %v1338_v6 }
  0x67   : > { %1237 = vmatpush3.bf16.msra.mxu1 %v1352_v19 }
  0x68   : > { %1238 = vmatprep.subr.bf16.mxu1 %v1353_v20 }
  0x69   : > { %1209 = vmatpush3.bf16.msra.mxu0 %v1338_v6 }
  0x6a   : > { %1210 = vmatprep.subr.bf16.mxu0 %v1339_v7 }
  0x6b   : > { %1239 = vmatpush3.bf16.msra.mxu1 %v1353_v20 }
  0x6c   : > { %1240 = vmatprep.subr.bf16.mxu1 %v1354_v21 }
  0x6d   : > { %1211 = vmatpush3.bf16.msra.mxu0 %v1339_v7 }
  0x6e   : > { %1212 = vmatprep.subr.bf16.mxu0 %v1340_v8 }
  0x6f   : > { %1241 = vmatpush3.bf16.msra.mxu1 %v1354_v21 }
  0x70   : > { %1242 = vmatprep.subr.bf16.mxu1 %v1355_v22 }
  0x71   : > { %1213 = vmatpush3.bf16.msra.mxu0 %v1340_v8 }
  0x73   : > { %1243 = vmatpush3.bf16.msra.mxu1 %v1355_v22 }
  0x74   : > { %1215 = vmatmul.mubr.bf16.vlgmr.msra.gmra.mxu0 %v1742_v9  ;;  %1244 = vmatprep.subr.bf16.mxu1 %v1356_v23 }
  0x75   : > { %1218 = vmatprep.mubr.bf16.mxu0 %v1745_v10 }
  0x77   : > { %1245 = vmatpush3.bf16.msra.mxu1 %v1356_v23 }
  0x7c   : > { %1219 = vmatmul.mubr.bf16.gmra.mxu0 %v1750_v11 }
  0x7d   : > { %1222 = vmatprep.mubr.bf16.mxu0 %v1753_v12 }
  0x84   : > { %1223 = vmatmul.mubr.bf16.gmra.mxu0 %v1758_v13 }
  0x85   : > { %1226 = vmatprep.mubr.bf16.mxu0 %v1761_v14 }
  0x8c   : > { %1227 = vmatmul.mubr.bf16.gmra.mxu0 %v1766_v15 }
 0x134   : > { %v1216_v30 = vpop.f32.mrf.mxu0 }
 0x135   : > { %v1780_v31 = vadd.f32 %v1216_v30, %v1777_v29 }
 0x136   : > { %v443_v32 = vpop.f32.mrf.mxu0 }
 0x137   : > { %v524_v33 = vmul.f32 0.044715, %v1780_v31  ;;  %v1784_v34 = vadd.f32 %v443_v32, %v1777_v29 }
 0x138   : > { %v1217_v35 = vpop.f32.mrf.mxu0 }
 0x139   : > { %v540_v36 = vmul.f32 %v524_v33, %v1780_v31  ;;  %v522_v37 = vmul.f32 0.044715, %v1784_v34  ;;  %v1789_v38 = vadd.f32 %v1217_v35, %v1777_v29 }
 0x13a   : > { %v446_v39 = vpop.f32.mrf.mxu0 }
 0x13b   : > { %v556_v40 = vmul.f32 %v540_v36, %v1780_v31  ;;  %v525_v41 = vmul.f32 0.044715, %v1789_v38  ;;  %v1794_v42 = vadd.f32 %v446_v39, %v1777_v29  ;;  %v538_v43 = vmul.f32 %v522_v37, %v1784_v34 }
 0x13c   : > { %v1220_v44 = vpop.f32.mrf.mxu0 }
 0x13d   : > { %v541_v45 = vmul.f32 %v525_v41, %v1789_v38  ;;  %v523_v46 = vmul.f32 0.044715, %v1794_v42  ;;  %v1800_v47 = vadd.f32 %v1220_v44, %v1777_v29  ;;  %v554_v49 = vmul.f32 %v538_v43, %v1784_v34 }
 0x13e   : > { %v459_v48 = vpop.f32.mrf.mxu0  ;;  %v572_v50 = vadd.f32 %v556_v40, %v1780_v31 }
 0x13f   : > { %v557_v51 = vmul.f32 %v541_v45, %v1789_v38  ;;  %v528_v52 = vmul.f32 0.044715, %v1800_v47  ;;  %v1807_v53 = vadd.f32 %v459_v48, %v1777_v29  ;;  %v539_v54 = vmul.f32 %v523_v46, %v1794_v42 }
 0x140   : > { %v1221_v55 = vpop.f32.mrf.mxu0  ;;  %v570_v56 = vadd.f32 %v554_v49, %v1784_v34  ;;  %v588_v57 = vmul.f32 0.7978846, %v572_v50 }
 0x141   : > { %v544_v58 = vmul.f32 %v528_v52, %v1800_v47  ;;  %v526_v59 = vmul.f32 0.044715, %v1807_v53  ;;  %v1814_v60 = vadd.f32 %v1221_v55, %v1777_v29  ;;  %v555_v61 = vmul.f32 %v539_v54, %v1794_v42 }
 0x142   : > { %v462_v62 = vpop.f32.mrf.mxu0  ;;  %v586_v63 = vmul.f32 0.7978846, %v570_v56  ;;  %v573_v0 = vadd.f32 %v557_v51, %v1789_v38  ;;  %1365 = vtanh.f32 %v588_v57 }
 0x143   : > { %v560_v1 = vmul.f32 %v544_v58, %v1800_v47  ;;  %v542_v2 = vmul.f32 %v526_v59, %v1807_v53  ;;  %v529_v3 = vmul.f32 0.044715, %v1814_v60  ;;  %v1822_v5 = vadd.f32 %v462_v62, %v1777_v29 }
 0x144   : > { %v1224_v6 = vpop.f32.mrf.mxu0  ;;  %v571_v7 = vadd.f32 %v555_v61, %v1794_v42  ;;  %1367 = vtanh.f32 %v586_v63  ;;  %v589_v8 = vmul.f32 0.7978846, %v573_v0  ;;  %v508_v58 = vmul.f32 0.5, %v1780_v31 }
 0x145   : > { %v558_v16 = vmul.f32 %v542_v2, %v1807_v53  ;;  %v545_v17 = vmul.f32 %v529_v3, %v1814_v60  ;;  %v527_v18 = vmul.f32 0.044715, %v1822_v5  ;;  %v1829_v19 = vadd.f32 %v1224_v6, %v1777_v29 }
 0x146   : > { %v475_v20 = vpop.f32.mrf.mxu0  ;;  %v587_v21 = vmul.f32 0.7978846, %v571_v7  ;;  %1369 = vtanh.f32 %v589_v8  ;;  %v576_v22 = vadd.f32 %v560_v1, %v1800_v47  ;;  %v506_v6 = vmul.f32 0.5, %v1784_v34 }
 0x147   : > { %v561_v23 = vmul.f32 %v545_v17, %v1814_v60  ;;  %v543_v24 = vmul.f32 %v527_v18, %v1822_v5  ;;  %v532_v26 = vmul.f32 0.044715, %v1829_v19  ;;  %v1836_v27 = vadd.f32 %v475_v20, %v1777_v29 }
 0x148   : > { %v1225_v30 = vpop.f32.mrf.mxu0  ;;  %1371 = vtanh.f32 %v587_v21  ;;  %v574_v32 = vadd.f32 %v558_v16, %v1807_v53  ;;  %v592_v33 = vmul.f32 0.7978846, %v576_v22  ;;  %v509_v7 = vmul.f32 0.5, %v1789_v38 }
 0x149   : > { %v559_v35 = vmul.f32 %v543_v24, %v1822_v5  ;;  %v548_v36 = vmul.f32 %v532_v26, %v1829_v19  ;;  %v530_v37 = vmul.f32 0.044715, %v1836_v27  ;;  %v1843_v39 = vadd.f32 %v1225_v30, %v1777_v29 }
 0x14a   : > { %v478_v40 = vpop.f32.mrf.mxu0  ;;  %v590_v41 = vmul.f32 0.7978846, %v574_v32  ;;  %v577_v43 = vadd.f32 %v561_v23, %v1814_v60  ;;  %1373 = vtanh.f32 %v592_v33  ;;  %v507_v20 = vmul.f32 0.5, %v1794_v42 }
 0x14b   : > { %v564_v44 = vmul.f32 %v548_v36, %v1829_v19  ;;  %v546_v45 = vmul.f32 %v530_v37, %v1836_v27  ;;  %v533_v46 = vmul.f32 0.044715, %v1843_v39  ;;  %v1850_v48 = vadd.f32 %v478_v40, %v1777_v29 }
 0x14c   : > { %v1228_v49 = vpop.f32.mrf.mxu0  ;;  %v575_v50 = vadd.f32 %v559_v35, %v1822_v5  ;;  %1375 = vtanh.f32 %v590_v41  ;;  %v593_v51 = vmul.f32 0.7978846, %v577_v43 }
 0x14d   : > { %v562_v52 = vmul.f32 %v546_v45, %v1836_v27  ;;  %v549_v54 = vmul.f32 %v533_v46, %v1843_v39  ;;  %v531_v55 = vmul.f32 0.044715, %v1850_v48  ;;  %v1857_v56 = vadd.f32 %v1228_v49, %v1777_v29 }
 0x14e   : > { %v491_v57 = vpop.f32.mrf.mxu0  ;;  %v591_v59 = vmul.f32 0.7978846, %v575_v50  ;;  %1377 = vtanh.f32 %v593_v51  ;;  %v580_v61 = vadd.f32 %v564_v44, %v1829_v19 }
 0x14f   : > { %v1366_v62 = vpop.eup %1365  ;;  %v565_v63 = vmul.f32 %v549_v54, %v1843_v39  ;;  %v547_v0 = vmul.f32 %v531_v55, %v1850_v48  ;;  %v536_v1 = vmul.f32 0.044715, %v1857_v56  ;;  %v1865_v2 = vadd.f32 %v491_v57, %v1777_v29 }
 0x150   : > { %v1229_v3 = vpop.f32.mrf.mxu0  ;;  %1379 = vtanh.f32 %v591_v59  ;;  %v578_v31 = vadd.f32 %v562_v52, %v1836_v27  ;;  %v620_v22 = vadd.f32 1.0, %v1366_v62  ;;  %v596_v24 = vmul.f32 0.7978846, %v580_v61 }
 0x151   : > { %v1368_v8 = vpop.eup %1367  ;;  %v563_v16 = vmul.f32 %v547_v0, %v1850_v48  ;;  %v534_v17 = vmul.f32 0.044715, %v1865_v2  ;;  %v1873_v18 = vadd.f32 %v1229_v3, %v1777_v29  ;;  %v581_v34 = vadd.f32 %v565_v63, %v1843_v39 }
 0x152   : > { %v494_v21 = vpop.f32.mrf.mxu0  ;;  %v594_v23 = vmul.f32 0.7978846, %v578_v31  ;;  %v552_v26 = vmul.f32 %v536_v1, %v1857_v56  ;;  %v618_v35 = vadd.f32 1.0, %v1368_v8  ;;  %v636_v57 = vmul.f32 %v620_v22, %v508_v58 }
 0x153   : > { %v1370_v38 = vpop.eup %1369  ;;  %v550_v30 = vmul.f32 %v534_v17, %v1865_v2  ;;  %v537_v32 = vmul.f32 0.044715, %v1873_v18  ;;  %v1881_v33 = vadd.f32 %v494_v21, %v1777_v29  ;;  %v579_v42 = vadd.f32 %v563_v16, %v1850_v48 }
 0x154   : > { %v621_v36 = vadd.f32 1.0, %v1370_v38  ;;  %1381 = vtanh.f32 %v594_v23  ;;  %v597_v44 = vmul.f32 0.7978846, %v581_v34  ;;  %v568_v29 = vmul.f32 %v552_v26, %v1857_v56 }
 0x155   : > { %v1372_v37 = vpop.eup %1371  ;;  %v566_v40 = vmul.f32 %v550_v30, %v1865_v2  ;;  %v553_v41 = vmul.f32 %v537_v32, %v1873_v18  ;;  %v535_v43 = vmul.f32 0.044715, %v1881_v33  ;;  %v595_v49 = vmul.f32 0.7978846, %v579_v42 }
 0x156   : > { %v619_v45 = vadd.f32 1.0, %v1372_v37  ;;  %v637_v46 = vmul.f32 %v621_v36, %v509_v7  ;;  %1383 = vtanh.f32 %v596_v24  ;;  %v634_v54 = vmul.f32 %v618_v35, %v506_v6 }
 0x157   : > { %v1374_v50 = vpop.eup %1373  ;;  %v569_v51 = vmul.f32 %v553_v41, %v1873_v18  ;;  %v551_v52 = vmul.f32 %v535_v43, %v1881_v33  ;;  %1385 = vtanh.f32 %v597_v44  ;;  %v582_v62 = vadd.f32 %v566_v40, %v1865_v2 }
 0x158   : > { %v635_v55 = vmul.f32 %v619_v45, %v507_v20  ;;  %1387 = vtanh.f32 %v595_v49  ;;  %v651_v0 = vpack.c.bf16 %v637_v46, %v636_v57  ;;  %v584_v31 = vadd.f32 %v568_v29, %v1857_v56 }
 0x159   : > { %v1376_v59 = vpop.eup %1375  ;;  %v567_v61 = vmul.f32 %v551_v52, %v1881_v33  ;;  %v598_v7 = vmul.f32 0.7978846, %v582_v62  ;;  %v585_v8 = vadd.f32 %v569_v51, %v1873_v18  ;;  %v513_v58 = vmul.f32 0.5, %v1814_v60 }
 0x15a   : > { %v650_v63 = vpack.c.bf16 %v635_v55, %v634_v54  ;;  %v622_v6 = vadd.f32 1.0, %v1376_v59  ;;  %v624_v16 = vadd.f32 1.0, %v1374_v50  ;;  %v600_v22 = vmul.f32 0.7978846, %v584_v31 }
 0x15b   : > { %v1378_v1 = vpop.eup %1377  ;;  %v583_v3 = vadd.f32 %v567_v61, %v1881_v33  ;;  %1389 = vtanh.f32 %v598_v7  ;;  %v601_v23 = vmul.f32 0.7978846, %v585_v8  ;;  %v510_v34 = vmul.f32 0.5, %v1807_v53 }
 0x15c   : > { %1246 = vmatprep.mubr.bf16.mxu1 %v650_v63  ;;  %v625_v17 = vadd.f32 1.0, %v1378_v1  ;;  %v511_v24 = vmul.f32 0.5, %v1822_v5  ;;  %v512_v26 = vmul.f32 0.5, %v1800_v47  ;;  %v517_v5 = vmul.f32 0.5, %v1843_v39 }
 0x15d   : > { %v1380_v20 = vpop.eup %1379  ;;  %1247 = vmatmul.mubr.bf16.vlgmr.msra.gmra.mxu1 %v651_v0  ;;  %v599_v21 = vmul.f32 0.7978846, %v583_v3  ;;  %v638_v32 = vmul.f32 %v622_v6, %v510_v34  ;;  %v514_v45 = vmul.f32 0.5, %v1836_v27  ;;  %v515_v46 = vmul.f32 0.5, %v1850_v48 }
 0x15e   : > { %v623_v38 = vadd.f32 1.0, %v1380_v20  ;;  %v641_v30 = vmul.f32 %v625_v17, %v513_v58  ;;  %v640_v36 = vmul.f32 %v624_v16, %v512_v26  ;;  %v516_v50 = vmul.f32 0.5, %v1829_v19 }
 0x15f   : > { %1391 = vtanh.f32 %v599_v21  ;;  %v518_v63 = vmul.f32 0.5, %v1865_v2  ;;  %v519_v27 = vmul.f32 0.5, %v1881_v33  ;;  %v520_v19 = vmul.f32 0.5, %v1857_v56  ;;  %v674_v2 = vld [vmem:[%s2012_s4] sm:$0x1] }
 0x160   : > { %v639_v35 = vmul.f32 %v623_v38, %v511_v24  ;;  %1393 = vtanh.f32 %v600_v22  ;;  %v653_v40 = vpack.c.bf16 %v641_v30, %v640_v36  ;;  %v521_v31 = vmul.f32 0.5, %v1873_v18 }
 0x161   : > { %v1382_v60 = vpop.eup %1381  ;;  %1395 = vtanh.f32 %v601_v23  ;;  %v675_v33 = vunpack.c.l.bf16 %v674_v2  ;;  %v827_v22 = vunpack.c.l.bf16 %v1742_v9  ;;  %v828_v23 = vunpack.c.h.bf16 %v1742_v9 }
 0x162   : > { %v652_v42 = vpack.c.bf16 %v639_v35, %v638_v32  ;;  %v626_v43 = vadd.f32 1.0, %v1382_v60  ;;  %v825_v24 = vunpack.c.l.bf16 %v1738_v4  ;;  %v826_v38 = vunpack.c.h.bf16 %v1738_v4 }
 0x163   : > { %v1384_v37 = vpop.eup %1383  ;;  %v1912_v56 = vrot.slane %v675_v33, %v311_v28 }
 0x164   : > { %v1386_v41 = vpop.eup %1385  ;;  %1250 = vmatprep.mubr.bf16.mxu1 %v652_v42  ;;  %v628_v44 = vadd.f32 1.0, %v1384_v37  ;;  %v642_v51 = vmul.f32 %v626_v43, %v514_v45  ;;  %v832_v43 = vunpack.c.h.bf16 %v1750_v11  ;;  %v830_v45 = vunpack.c.h.bf16 %v1745_v10 }
 0x165   : > { %v1388_v53 = vpop.eup %1387  ;;  %1251 = vmatmul.mubr.bf16.gmra.mxu1 %v653_v40  ;;  %v629_v47 = vadd.f32 1.0, %v1386_v41  ;;  %v831_v41 = vunpack.c.l.bf16 %v1750_v11 }
 0x166   : > { %v627_v49 = vadd.f32 1.0, %v1388_v53  ;;  %v644_v54 = vmul.f32 %v628_v44, %v516_v50  ;;  %v829_v44 = vunpack.c.l.bf16 %v1745_v10 }
 0x167   : > { %v645_v29 = vmul.f32 %v629_v47, %v517_v5 }
 0x168   : > { %v643_v52 = vmul.f32 %v627_v49, %v515_v46  ;;  %v1390_v55 = vpop.eup %1389 }
 0x169   : > { %v655_v59 = vpack.c.bf16 %v645_v29, %v644_v54  ;;  %v630_v61 = vadd.f32 1.0, %v1390_v55 }
 0x16a   : > { %v654_v57 = vpack.c.bf16 %v643_v52, %v642_v51 }
 0x16b   : > { %v646_v3 = vmul.f32 %v630_v61, %v518_v63  ;;  %v835_v61 = vunpack.c.l.bf16 %v1758_v13  ;;  %v833_v63 = vunpack.c.l.bf16 %v1753_v12 }
 0x16c   : > { %v1392_v62 = vpop.eup %1391  ;;  %1254 = vmatprep.mubr.bf16.mxu1 %v654_v57 }
 0x16d   : > { %v1394_v39 = vpop.eup %1393  ;;  %1255 = vmatmul.mubr.bf16.gmra.mxu1 %v655_v59  ;;  %v631_v48 = vadd.f32 1.0, %v1392_v62  ;;  %v836_v62 = vunpack.c.h.bf16 %v1758_v13 }
 0x16e   : > { %v1396_v0 = vpop.eup %1395  ;;  %v632_v1 = vadd.f32 1.0, %v1394_v39 }
 0x16f   : > { %v647_v7 = vmul.f32 %v631_v48, %v519_v27  ;;  %v633_v8 = vadd.f32 1.0, %v1396_v0  ;;  %v834_v48 = vunpack.c.h.bf16 %v1753_v12  ;;  %v840_v12 = vunpack.c.h.bf16 %v1766_v15 }
 0x170   : > { %v648_v58 = vmul.f32 %v632_v1, %v520_v19 }
 0x171   : > { %v656_v6 = vpack.c.bf16 %v647_v7, %v646_v3  ;;  %v649_v16 = vmul.f32 %v633_v8, %v521_v31 }
 0x173   : > { %1258 = vmatprep.mubr.bf16.mxu1 %v656_v6  ;;  %v657_v17 = vpack.c.bf16 %v649_v16, %v648_v58 }
 0x175   : > { %1259 = vmatmul.mubr.bf16.gmra.mxu1 %v657_v17  ;;  %v839_v17 = vunpack.c.l.bf16 %v1766_v15 }
 0x21d   : > { %v1248_v20 = vpop.f32.mrf.mxu1 }
 0x21e   : > { %v771_v18 = vadd.f32 %v1248_v20, %v1912_v56  ;;  %v837_v20 = vunpack.c.l.bf16 %v1761_v14 }
 0x21f   : > { %v762_v21 = vpop.f32.mrf.mxu1 }
 0x220   : > { %v763_v26 = vadd.f32 %v762_v21, %v1912_v56  ;;  %v843_v30 = vadd.f32 %v827_v22, %v771_v18  ;;  %v838_v18 = vunpack.c.h.bf16 %v1761_v14 }
 0x221   : > { %v1249_v34 = vpop.f32.mrf.mxu1 }
 0x222   : > { %v774_v25 = vadd.f32 %v1249_v34, %v1912_v56  ;;  %v841_v36 = vadd.f32 %v825_v24, %v763_v26 }
 0x223   : > { %v765_v28 = vpop.f32.mrf.mxu1 }
 0x224   : > { %v844_v32 = vadd.f32 %v828_v23, %v774_v25  ;;  %v766_v35 = vadd.f32 %v765_v28, %v1912_v56 }
 0x225   : > { %v1252_v60 = vpop.f32.mrf.mxu1 }
 0x226   : > { %v1127_v42 = vpack.c.bf16 %v844_v32, %v843_v30  ;;  %v842_v37 = vadd.f32 %v826_v38, %v766_v35  ;;  %v787_v9 = vadd.f32 %v1252_v60, %v1912_v56 }
 0x227   : > { %v778_v40 = vpop.f32.mrf.mxu1 }
 0x228   : > { %1159 = vst [vmem:[%s1924_s12 + $0x8] sm:$0xff] %v1127_v42   ;;  %v1122_v4 = vpack.c.bf16 %v842_v37, %v841_v36  ;;  %v779_v5 = vadd.f32 %v778_v40, %v1912_v56  ;;  %v847_v49 = vadd.f32 %v831_v41, %v787_v9 }
 0x229   : > { %v1253_v53 = vpop.f32.mrf.mxu1 }
 0x22a   : > { %1123 = vst [vmem:[%s1924_s12] sm:$0xff] %v1122_v4   ;;  %v790_v47 = vadd.f32 %v1253_v53, %v1912_v56  ;;  %v845_v52 = vadd.f32 %v829_v44, %v779_v5 }
 0x22b   : > { %v781_v46 = vpop.f32.mrf.mxu1 }
 0x22c   : > { %v848_v50 = vadd.f32 %v832_v43, %v790_v47  ;;  %v782_v29 = vadd.f32 %v781_v46, %v1912_v56 }
 0x22d   : > { %v1256_v51 = vpop.f32.mrf.mxu1 }
 0x22e   : > { %v1137_v11 = vpack.c.bf16 %v848_v50, %v847_v49  ;;  %v846_v54 = vadd.f32 %v830_v45, %v782_v29  ;;  %v803_v59 = vadd.f32 %v1256_v51, %v1912_v56 }
 0x22f   : > { %v794_v55 = vpop.f32.mrf.mxu1 }
 0x230   : > { %1161 = vst [vmem:[%s1924_s12 + $0x18] sm:$0xff] %v1137_v11   ;;  %v1132_v57 = vpack.c.bf16 %v846_v54, %v845_v52  ;;  %v795_v39 = vadd.f32 %v794_v55, %v1912_v56  ;;  %v851_v19 = vadd.f32 %v835_v61, %v803_v59 }
 0x231   : > { %v1257_v10 = vpop.f32.mrf.mxu1 }
 0x232   : > { %1160 = vst [vmem:[%s1924_s12 + $0x10] sm:$0xff] %v1132_v57   ;;  %v806_v27 = vadd.f32 %v1257_v10, %v1912_v56  ;;  %v849_v31 = vadd.f32 %v833_v63, %v795_v39 }
 0x233   : > { %v797_v0 = vpop.f32.mrf.mxu1 }
 0x234   : > { %v852_v1 = vadd.f32 %v836_v62, %v806_v27  ;;  %v798_v3 = vadd.f32 %v797_v0, %v1912_v56 }
 0x235   : > { %v1260_v7 = vpop.f32.mrf.mxu1 }
 0x236   : > { %v1147_v13 = vpack.c.bf16 %v852_v1, %v851_v19  ;;  %v850_v8 = vadd.f32 %v834_v48, %v798_v3  ;;  %v819_v16 = vadd.f32 %v1260_v7, %v1912_v56 }
 0x237   : > { %v810_v6 = vpop.f32.mrf.mxu1 }
 0x238   : > { %1163 = vst [vmem:[%s1924_s12 + $0x28] sm:$0xff] %v1147_v13   ;;  %v1142_v58 = vpack.c.bf16 %v850_v8, %v849_v31  ;;  %v811_v33 = vadd.f32 %v810_v6, %v1912_v56  ;;  %v855_v23 = vadd.f32 %v839_v17, %v819_v16 }
 0x239   : > { %v1261_v2 = vpop.f32.mrf.mxu1 }
 0x23a   : > { %1162 = vst [vmem:[%s1924_s12 + $0x20] sm:$0xff] %v1142_v58   ;;  %v822_v21 = vadd.f32 %v1261_v2, %v1912_v56  ;;  %v853_v15 = vadd.f32 %v837_v20, %v811_v33 }
 0x23b   : > { %v813_v22 = vpop.f32.mrf.mxu1 }
 0x23c   : > { %v856_v34 = vadd.f32 %v840_v12, %v822_v21  ;;  %v814_v24 = vadd.f32 %v813_v22, %v1912_v56 }
 0x23e   : > { %v1157_v38 = vpack.c.bf16 %v856_v34, %v855_v23  ;;  %v854_v26 = vadd.f32 %v838_v18, %v814_v24 }
 0x240   : > { %1165 = vst [vmem:[%s1924_s12 + $0x38] sm:$0xff] %v1157_v38   ;;  %v1152_v14 = vpack.c.bf16 %v854_v26, %v853_v15 }
 0x242   : > { %1164 = vst [vmem:[%s1924_s12 + $0x30] sm:$0xff] %v1152_v14  }
 0x243   : > { %1490 = shalt.err (!%p1487_p3)
}
 0x244   : > { %s1491_s13 = scalar_lea.hbm %s1961_s11, 1024  ;;  %s1495_s9 = scalar_lea.hbm %s2013_s5, 2048 }
 0x245   : > { %p1492_p11 = scmp.ne.s32.totalorder %s1961_s11, %s1491_s13  ;;  %p1496_p4 = scmp.lt.s32.totalorder %s1961_s11, %s2013_s5 }
 0x246   : > { %p1497_p6 = scmp.lt.s32.totalorder %s1495_s9, %s1491_s13 }
 0x247   : > { %p1493_p9 = pnand %p1492_p11, %p2030_p2 }
 0x248   : > { %p1498_p8 = por %p1497_p6, %p1496_p4 }
 0x249   : > { %p1494_p1 = pneg %p1493_p9 }
 0x24b   : > { %p1499_p5 = pnand %p1498_p8, %p1494_p1 }
 0x24d   : > { %1502 = shalt.err (!%p1499_p5)
}
 0x24e   : > { %s1553_s14 = smov 64   ;;  %s1554_s7 = smov 4  }
 0x24f   : > { %1272 = dma.vmem_to_hbm [thread:$0]  (%p2030_p2), %s1963_s6, 1024, %s1961_s11, %s938_s17, %s1553_s14, %s1553_s14, %s1554_s7  }
 0x250 PF: > { %s966_s28 = sand.u32 1, %s1533_s18   ;;  %p2031_p7 = scmp.ne.s32.totalorder %s2020_s25, 0 }
 0x251   : > { %p2032_p12 = scmp.ge.s32.totalorder %s1545_s21, 2  ;;  %s967_s16 = scalar_lea.sflag [#allocation4], %s966_s28 }
 0x253   : > { %p1286_p13 = pnand %p2032_p12, %p2031_p7 }
 0x255   : > { %p1287_p0 = pneg %p1286_p13 }
 0x257   : > { %1528 = dma.done.wait (%p1287_p0), %s967_s16, 1024  }
 0x258   : > { %1530 = vsyncadd (%p1287_p0), %s967_s16, 4294966272  ;;  %p19_p10 = scmp.ge.s32.totalorder %s1663_s15, 4   ;;  %s2033_s18 = smov %s1537_s19 }
 0x259   : > { %s2034_s19 = smov %s1541_s20  ;;  %s2035_s20 = smov %s1679_s27 }
 0x25a   : > { %s2036_s21 = smov %s1663_s15  ;;  %21 = sbr.rel (!%p19_p10) target bundleno = 6 (0x6), region = 93 }
 0x25f   :  { %972 = vsyncpa [#allocation3], 1 }
 0x260   :  { %974 = vsyncpa [#allocation3 + $0x1], 1 }
 0x261   :  { %975 = vsyncpa [#allocation6], 1 }
 0x262   :  { %976 = vsyncpa [#allocation4], 1 }
 0x263   :  { %978 = vsyncpa [#allocation4 + $0x1], 1 }

</bundles_post_ra>
